<compile_context>
chip_gen: v6e
topology: v6e:2x2x1
jax: 0.10.0
libtpu: 0.0.40
codegen_flags: <defaults>
</compile_context>

<pallas_src>
import jax
import jax.numpy as jnp
from jax.experimental import pallas as pl
from jax.experimental.pallas import tpu as pltpu

N_CLASSES = 2
N_FEATURES = 100
PSI_DIM = 10

_PALLAS_MIN_T = 256   # below this, fixed pallas_call overhead dominates
_MAX_TILE_T = 1024    # 1024x100 f32 tile, double buffered: ~0.8 MiB VMEM


def _cdiv(a, b):
    return (a + b - 1) // b


def _round_up(n, m):
    return _cdiv(n, m) * m


def _structured_kernel(w_ref, x_ref, out_ref):
    """w: (F, K) VMEM-resident weights, x: (TILE_T, F) streamed tile,
    out: (TILE_T, K).  One MXU matmul per grid step; x is the natural LHS so
    no per-tile transpose of the streamed data is needed."""
    out_ref[...] = jnp.dot(x_ref[...], w_ref[...],
                           preferred_element_type=jnp.float32)


def _fold_psi_into_A(A_real, A_imag, psi_real, psi_imag):
    """Effective weights W[k, a] = sum_{i,j} M_r[i,j]*A_r[k,i,j,a]
                                            - M_i[i,j]*A_i[k,i,j,a]."""
    f32 = jnp.float32
    pr = psi_real.astype(f32)
    pi = psi_imag.astype(f32)
    m_r = jnp.outer(pr, pr) - jnp.outer(pi, pi)                     # (I, J)
    m_i = jnp.outer(pr, pi) + jnp.outer(pi, pr)                     # (I, J)
    w = (jnp.einsum('ij,kija->ka', m_r, A_real.astype(f32))
         - jnp.einsum('ij,kija->ka', m_i, A_imag.astype(f32)))      # (K, F)
    return w


def complex_net_structured(x, A_real, A_imag, psi_real, psi_imag):
    """x: (T, N_FEATURES) float -> (N_CLASSES, T) float32."""
    T, F = x.shape
    K = A_real.shape[0]
    x_f32 = x.astype(jnp.float32)

    # Hoisted psi fold: tiny (K, F) weight computed once by XLA.
    w = _fold_psi_into_A(A_real, A_imag, psi_real, psi_imag)        # (K, F)

    if T < _PALLAS_MIN_T:
        # Tiny batch: a fused XLA dot beats the fixed pallas_call + DMA-prime
        # overhead and avoids padding 90%+ of the work.
        return jnp.dot(w, x_f32.T)                                  # (K, T)

    # Tile over T: up to 1024 rows per step (amortizes ~0.35us/step), and at
    # least 2 grid steps when possible so v7x's dual TensorCores both work.
    tile_t = min(_MAX_TILE_T, _round_up(_cdiv(T, 2), 128))
    grid = (_cdiv(T, tile_t),)

    # x streams in UNPADDED; a ragged last tile's OOB rows only feed OOB
    # output rows, which Pallas never writes back (contraction is over F
    # only -- do not add any in-kernel reduction over T).
    out_tk = pl.pallas_call(
        _structured_kernel,
        out_shape=jax.ShapeDtypeStruct((T, K), jnp.float32),
        grid=grid,
        in_specs=[
            pl.BlockSpec((F, K), lambda t: (0, 0)),        # W^T, VMEM-resident
            pl.BlockSpec((tile_t, F), lambda t: (t, 0)),   # x tile, streamed
        ],
        out_specs=pl.BlockSpec((tile_t, K), lambda t: (t, 0)),
        compiler_params=pltpu.CompilerParams(
            dimension_semantics=("parallel",)),
    )(w.T, x_f32)

    # Output traffic is ~1/50 of input; transposing the (T, 2) result here is
    # cheaper than forcing a lane-dense store / in-kernel transpose.
    return out_tk.T


def reference(x, A_real, A_imag, psi_real, psi_imag):
    """Direct transcription of the PyTorch ComplexOps.complex_einsum_structured."""
    x_imag = jnp.zeros_like(x)
    psi_conj_real = psi_real
    psi_conj_imag = -psi_imag
    temp1_real = (jnp.einsum('i,kija->kja', psi_conj_real, A_real)
                  + jnp.einsum('i,kija->kja', psi_conj_imag, A_imag))
    temp1_imag = (jnp.einsum('i,kija->kja', psi_conj_real, A_imag)
                  - jnp.einsum('i,kija->kja', psi_conj_imag, A_real))
    temp2_real = (jnp.einsum('kja,ta->ktj', temp1_real, x)
                  - jnp.einsum('kja,ta->ktj', temp1_imag, x_imag))
    temp2_imag = (jnp.einsum('kja,ta->ktj', temp1_real, x_imag)
                  + jnp.einsum('kja,ta->ktj', temp1_imag, x))
    result_real = (jnp.einsum('ktj,j->kt', temp2_real, psi_real)
                   - jnp.einsum('ktj,j->kt', temp2_imag, psi_imag))
    return result_real


if __name__ == "__main__":
    key = jax.random.PRNGKey(0)
    k1, k2, k3, k4, k5, k6 = jax.random.split(key, 6)

    A_real = jax.random.normal(k1, (N_CLASSES, PSI_DIM, PSI_DIM, N_FEATURES), jnp.float32)
    A_imag = jax.random.normal(k2, (N_CLASSES, PSI_DIM, PSI_DIM, N_FEATURES), jnp.float32)
    psi_real = jax.random.normal(k3, (PSI_DIM,), jnp.float32)
    psi_imag = jax.random.normal(k4, (PSI_DIM,), jnp.float32)

    forward = jax.jit(complex_net_structured)

    # Larger-T path: exercises the Pallas kernel (2 "parallel" tiles of 512).
    T_big = 1024
    x_big = jax.random.normal(k5, (T_big, N_FEATURES), jnp.float32)
    out_big = jax.block_until_ready(forward(x_big, A_real, A_imag, psi_real, psi_imag))
    ref_big = reference(x_big, A_real, A_imag, psi_real, psi_imag)
    assert out_big.shape == (N_CLASSES, T_big), out_big.shape
    assert jnp.allclose(out_big, ref_big, rtol=2e-3, atol=2e-2)

    # Tiny-T path (module's typical small batch): XLA fallback, same math.
    T_small = 8
    x_small = jax.random.normal(k6, (T_small, N_FEATURES), jnp.float32)
    out_small = jax.block_until_ready(forward(x_small, A_real, A_imag, psi_real, psi_imag))
    ref_small = reference(x_small, A_real, A_imag, psi_real, psi_imag)
    assert out_small.shape == (N_CLASSES, T_small), out_small.shape
    assert jnp.allclose(out_small, ref_small, rtol=2e-3, atol=2e-2)

    print("KERNEL_OK")
</pallas_src>

<mosaic_0001>
module attributes {stable_mosaic.version = 11 : i64} {
  func.func @_structured_kernel(%arg0: i32, %arg1: memref<100x2xf32, #tpu.memory_space<vmem>>, %arg2: memref<512x100xf32, #tpu.memory_space<vmem>>, %arg3: memref<512x2xf32, #tpu.memory_space<vmem>>) attributes {dimension_semantics = [#tpu.dimension_semantics<parallel>], iteration_bounds = array<i64: 2>, scalar_prefetch = 0 : i64, scratch_operands = 0 : i64, tpu.core_type = #tpu.core_type<tc>, window_params = [{pipeline_mode = #tpu.pipeline_mode<synchronous>, transform_indices = @transform_0, window_bounds = array<i64: 100, 2>}, {transform_indices = @transform_1, window_bounds = array<i64: 512, 100>}, {transform_indices = @transform_2, window_bounds = array<i64: 512, 2>}]} {
    %c0 = arith.constant 0 : index
    %c0_0 = arith.constant 0 : index
    %0 = vector.load %arg2[%c0, %c0_0] : memref<512x100xf32, #tpu.memory_space<vmem>>, vector<512x100xf32>
    %c0_1 = arith.constant 0 : index
    %c0_2 = arith.constant 0 : index
    %1 = vector.load %arg1[%c0_1, %c0_2] : memref<100x2xf32, #tpu.memory_space<vmem>>, vector<100x2xf32>
    %cst = arith.constant dense<0.000000e+00> : vector<512x2xf32>
    %2 = tpu.matmul %0, %1, %cst {dimension_numbers = #tpu.dot_dimension_numbers<[1], [0], [0], [1], [0, 0, 1, 1], [], []>} : vector<512x100xf32>, vector<100x2xf32>, vector<512x2xf32> -> vector<512x2xf32>
    %c0_3 = arith.constant 0 : index
    %c0_4 = arith.constant 0 : index
    %3 = vector.load %arg3[%c0_3, %c0_4] : memref<512x2xf32, #tpu.memory_space<vmem>>, vector<512x2xf32>
    tpu.vector_store %arg3[%c0_3, %c0_4], %2 {strides = array<i32>} : memref<512x2xf32, #tpu.memory_space<vmem>>, vector<512x2xf32>,
    return
  }
  func.func @transform_0(%arg0: i32) -> (i32, i32) {
    %c0_i32 = arith.constant 0 : i32
    %c0_i32_0 = arith.constant 0 : i32
    %c0_i32_1 = arith.constant 0 : i32
    return %c0_i32, %c0_i32_0 : i32, i32
  }
  func.func @transform_1(%arg0: i32) -> (i32, i32) {
    %c0_i32 = arith.constant 0 : i32
    %c0_i32_0 = arith.constant 0 : i32
    return %arg0, %c0_i32 : i32, i32
  }
  func.func @transform_2(%arg0: i32) -> (i32, i32) {
    %c0_i32 = arith.constant 0 : i32
    %c0_i32_0 = arith.constant 0 : i32
    return %arg0, %c0_i32 : i32, i32
  }
}

</mosaic_0001>

<bundles_post_ra>
// kernel: sub.1
= control target key start
LH: loop header
LB: loop body
LE: loop exit
PB: predicated region body
PF: predicated region fallthrough
CT: control target
= control target key end

     0   :  { %s34_s0 = inlined_call_operand.vmem [shape: f32[2,100], index: 0, kind: input, shape index: {}]   ;;  %s35_s1 = inlined_call_operand.vmem [shape: f32[2,100], index: 1, kind: input, shape index: {}]   ;;  %s36_s2 = inlined_call_operand.vmem [shape: f32[2,100], index: 2, kind: output, shape index: {}]  }
   0x1   :  { %v3_v0 = vld [vmem:[%s34_s0] sm:$0x3] }
   0x2   :  { %v4_v1 = vld [vmem:[%s35_s1] sm:$0x3] }
   0x3   :  { %v7_v2 = vsub.f32 %v3_v0, %v4_v1 }
   0x5   :  { %9 = vst [vmem:[%s36_s2] sm:$0x3] %v7_v2 }

// kernel: complex_net_structured.1
= control target key start
LH: loop header
LB: loop body
LE: loop exit
PB: predicated region body
PF: predicated region fallthrough
CT: control target
= control target key end

     0   :  { %s1259_s9 = smov 0   ;;  %s1582_s0 = inlined_call_operand.vmem [shape: f32[100,2], index: 0, kind: input, shape index: {}]   ;;  %s1583_s1 = inlined_call_operand.vmem [shape: f32[1024,100], index: 1, kind: input, shape index: {}]   ;;  %s1584_s2 = inlined_call_operand.vmem [shape: f32[1024,2], index: 2, kind: output, shape index: {}]  }
   0x1 LB: > { %s927_s10 = sadd.s32 4294967295, %s1242_s9   ;;  %p931_p0 = scmp.ge.s32.totalorder %s1242_s9, 1  ;;  %s1242_s9 = sphi %s1259_s9, %s12_s9  }
   0x2   : > { %p113_p1 = scmp.lt.s32.totalorder %s1242_s9, 3 }
   0x4   : > { %p114_p2 = pnand %p931_p0, %p113_p1 }
   0x5   : > { %s932_s21 = sshll.u32 (!%p114_p2), %s927_s10, 6 }
   0x6   : > { %117 = sbr.rel (%p114_p2) target bundleno = 295 (0x127), region = 28  ;;  %p136_p3 = scmp.lt.s32.totalorder (!%p114_p2), %s932_s21, 127 }
   0xb   : > { %v223_v0 = vld [vmem:[%s1582_s0 + $0x60] sm:$0xf]  ;;  %vm417_vm0 = vcmask 1043456   ;;  %v222_v1 = vld [vmem:[%s1582_s0 + $0x58] sm:$0xff]  ;;  %v221_v2 = vld [vmem:[%s1582_s0 + $0x50] sm:$0xff]  ;;  %s1586_s21 = smov (!%p136_p3, %s932_s21), 127 }
   0xc   : > { %1080 = vmatprep.subr.msk.mxu0 %vm417_vm0, %v223_v0  ;;  %1202 = vmatprep.subr.msk.mxu1 %vm417_vm0, %v223_v0  ;;  %v220_v3 = vld [vmem:[%s1582_s0 + $0x48] sm:$0xff]  ;;  %v219_v4 = vld [vmem:[%s1582_s0 + $0x40] sm:$0xff]  ;;  %v218_v5 = vld [vmem:[%s1582_s0 + $0x38] sm:$0xff]  ;;  %s933_s6 = sshll.u32 %s1586_s21, 3  ;;  %vm224_vm1 = vcmask 818176   ;;  %vm806_vm2 = vcmask 15360  }
   0xd   : > { %1081 = vmatpush3.msk.msra.mxu0 %vm417_vm0, %v223_v0  ;;  %1215 = vmatpush3.msk.msra.mxu1 %vm417_vm0, %v223_v0  ;;  %v217_v6 = vld [vmem:[%s1582_s0 + $0x30] sm:$0xff]  ;;  %v216_v7 = vld [vmem:[%s1582_s0 + $0x28] sm:$0xff]  ;;  %v215_v8 = vld [vmem:[%s1582_s0 + $0x20] sm:$0xff]  ;;  %s1311_s12 = scalar_lea.vmem %s1583_s1, %s933_s6  ;;  %s1449_s17 = scalar_lea.vmem %s1584_s2, %s933_s6 }
   0xe   : > { %1082 = vmatprep.subr.mxu0 %v222_v1  ;;  %1203 = vmatprep.subr.mxu1 %v222_v1  ;;  %v214_v9 = vld [vmem:[%s1582_s0 + $0x18] sm:$0xff]  ;;  %v213_v10 = vld [vmem:[%s1582_s0 + $0x10] sm:$0xff]  ;;  %v212_v11 = vld [vmem:[%s1582_s0 + $0x8] sm:$0xff] }
   0xf   : > { %1083 = vmatpush3.msra.mxu0 %v222_v1  ;;  %1216 = vmatpush3.msra.mxu1 %v222_v1  ;;  %v211_v12 = vld [vmem:[%s1582_s0] sm:$0xff]  ;;  %v148_v15 = vld [vmem:[%s1311_s12 + $0x8] sm:$0xff]  ;;  %v149_v17 = vld [vmem:[%s1311_s12 + $0x10] sm:$0xff] }
  0x10   : > { %1084 = vmatprep.subr.mxu0 %v221_v2  ;;  %1204 = vmatprep.subr.mxu1 %v221_v2  ;;  %v147_v13 = vld [vmem:[%s1311_s12] sm:$0xff]  ;;  %v180_v16 = vld [vmem:[%s1311_s12 + $0x108] sm:$0xff]  ;;  %v181_v18 = vld [vmem:[%s1311_s12 + $0x110] sm:$0xff] }
  0x11   : > { %1085 = vmatpush3.msra.mxu0 %v221_v2  ;;  %1217 = vmatpush3.msra.mxu1 %v221_v2  ;;  %v179_v14 = vld [vmem:[%s1311_s12 + $0x100] sm:$0xff]  ;;  %v150_v19 = vld [vmem:[%s1311_s12 + $0x18] sm:$0xff]  ;;  %v152_v23 = vld [vmem:[%s1311_s12 + $0x28] sm:$0xff] }
  0x12   : > { %1086 = vmatprep.subr.mxu0 %v220_v3  ;;  %1205 = vmatprep.subr.mxu1 %v220_v3  ;;  %v182_v20 = vld [vmem:[%s1311_s12 + $0x118] sm:$0xff]  ;;  %v151_v21 = vld [vmem:[%s1311_s12 + $0x20] sm:$0xff]  ;;  %v184_v24 = vld [vmem:[%s1311_s12 + $0x128] sm:$0xff] }
  0x13   : > { %1087 = vmatpush3.msra.mxu0 %v220_v3  ;;  %1218 = vmatpush3.msra.mxu1 %v220_v3  ;;  %v183_v22 = vld [vmem:[%s1311_s12 + $0x120] sm:$0xff]  ;;  %v153_v25 = vld [vmem:[%s1311_s12 + $0x30] sm:$0xff]  ;;  %v154_v27 = vld [vmem:[%s1311_s12 + $0x38] sm:$0xff] }
  0x14   : > { %1088 = vmatprep.subr.mxu0 %v219_v4  ;;  %1206 = vmatprep.subr.mxu1 %v219_v4  ;;  %v185_v26 = vld [vmem:[%s1311_s12 + $0x130] sm:$0xff]  ;;  %v186_v28 = vld [vmem:[%s1311_s12 + $0x138] sm:$0xff]  ;;  %v155_v29 = vld [vmem:[%s1311_s12 + $0x40] sm:$0xff] }
  0x15   : > { %1089 = vmatpush3.msra.mxu0 %v219_v4  ;;  %1219 = vmatpush3.msra.mxu1 %v219_v4  ;;  %v187_v30 = vld [vmem:[%s1311_s12 + $0x140] sm:$0xff]  ;;  %v156_v31 = vld [vmem:[%s1311_s12 + $0x48] sm:$0xff]  ;;  %v157_v33 = vld [vmem:[%s1311_s12 + $0x50] sm:$0xff] }
  0x16   : > { %1090 = vmatprep.subr.mxu0 %v218_v5  ;;  %1207 = vmatprep.subr.mxu1 %v218_v5  ;;  %v188_v32 = vld [vmem:[%s1311_s12 + $0x148] sm:$0xff]  ;;  %v189_v34 = vld [vmem:[%s1311_s12 + $0x150] sm:$0xff]  ;;  %v158_v35 = vld [vmem:[%s1311_s12 + $0x58] sm:$0xff] }
  0x17   : > { %1091 = vmatpush3.msra.mxu0 %v218_v5  ;;  %1220 = vmatpush3.msra.mxu1 %v218_v5  ;;  %v190_v36 = vld [vmem:[%s1311_s12 + $0x158] sm:$0xff]  ;;  %v159_v37 = vld [vmem:[%s1311_s12 + $0x60] sm:$0xff]  ;;  %v160_v39 = vld [vmem:[%s1311_s12 + $0x68] sm:$0xff] }
  0x18   : > { %1092 = vmatprep.subr.mxu0 %v217_v6  ;;  %1208 = vmatprep.subr.mxu1 %v217_v6  ;;  %v191_v38 = vld [vmem:[%s1311_s12 + $0x160] sm:$0xff]  ;;  %v192_v40 = vld [vmem:[%s1311_s12 + $0x168] sm:$0xff]  ;;  %v161_v41 = vld [vmem:[%s1311_s12 + $0x70] sm:$0xff] }
  0x19   : > { %1093 = vmatpush3.msra.mxu0 %v217_v6  ;;  %1221 = vmatpush3.msra.mxu1 %v217_v6  ;;  %v193_v42 = vld [vmem:[%s1311_s12 + $0x170] sm:$0xff]  ;;  %v162_v43 = vld [vmem:[%s1311_s12 + $0x78] sm:$0xff]  ;;  %v163_v45 = vld [vmem:[%s1311_s12 + $0x80] sm:$0xff] }
  0x1a   : > { %1094 = vmatprep.subr.mxu0 %v216_v7  ;;  %1209 = vmatprep.subr.mxu1 %v216_v7  ;;  %v194_v44 = vld [vmem:[%s1311_s12 + $0x178] sm:$0xff]  ;;  %v195_v46 = vld [vmem:[%s1311_s12 + $0x180] sm:$0xff]  ;;  %v164_v47 = vld [vmem:[%s1311_s12 + $0x88] sm:$0xff] }
  0x1b   : > { %1095 = vmatpush3.msra.mxu0 %v216_v7  ;;  %1222 = vmatpush3.msra.mxu1 %v216_v7  ;;  %v196_v48 = vld [vmem:[%s1311_s12 + $0x188] sm:$0xff]  ;;  %v165_v49 = vld [vmem:[%s1311_s12 + $0x90] sm:$0xff]  ;;  %v166_v51 = vld [vmem:[%s1311_s12 + $0x98] sm:$0xff] }
  0x1c   : > { %1096 = vmatprep.subr.mxu0 %v215_v8  ;;  %1210 = vmatprep.subr.mxu1 %v215_v8  ;;  %v197_v50 = vld [vmem:[%s1311_s12 + $0x190] sm:$0xff]  ;;  %v198_v52 = vld [vmem:[%s1311_s12 + $0x198] sm:$0xff]  ;;  %v167_v53 = vld [vmem:[%s1311_s12 + $0xa0] sm:$0xff] }
  0x1d   : > { %1097 = vmatpush3.msra.mxu0 %v215_v8  ;;  %1223 = vmatpush3.msra.mxu1 %v215_v8  ;;  %v199_v54 = vld [vmem:[%s1311_s12 + $0x1a0] sm:$0xff]  ;;  %v168_v55 = vld [vmem:[%s1311_s12 + $0xa8] sm:$0xff]  ;;  %v169_v57 = vld [vmem:[%s1311_s12 + $0xb0] sm:$0xff] }
  0x1e   : > { %1098 = vmatprep.subr.mxu0 %v214_v9  ;;  %1211 = vmatprep.subr.mxu1 %v214_v9  ;;  %v200_v56 = vld [vmem:[%s1311_s12 + $0x1a8] sm:$0xff]  ;;  %v201_v58 = vld [vmem:[%s1311_s12 + $0x1b0] sm:$0xff]  ;;  %v170_v59 = vld [vmem:[%s1311_s12 + $0xb8] sm:$0xff] }
  0x1f   : > { %1099 = vmatpush3.msra.mxu0 %v214_v9  ;;  %1224 = vmatpush3.msra.mxu1 %v214_v9  ;;  %v202_v60 = vld [vmem:[%s1311_s12 + $0x1b8] sm:$0xff]  ;;  %v171_v61 = vld [vmem:[%s1311_s12 + $0xc0] sm:$0xff]  ;;  %v172_v63 = vld [vmem:[%s1311_s12 + $0xc8] sm:$0xff] }
  0x20   : > { %1100 = vmatprep.subr.mxu0 %v213_v10  ;;  %1212 = vmatprep.subr.mxu1 %v213_v10  ;;  %v203_v62 = vld [vmem:[%s1311_s12 + $0x1c0] sm:$0xff]  ;;  %v204_v0 = vld [vmem:[%s1311_s12 + $0x1c8] sm:$0xff]  ;;  %v173_v1 = vld [vmem:[%s1311_s12 + $0xd0] sm:$0xff] }
  0x21   : > { %1101 = vmatpush3.msra.mxu0 %v213_v10  ;;  %1225 = vmatpush3.msra.mxu1 %v213_v10  ;;  %v205_v2 = vld [vmem:[%s1311_s12 + $0x1d0] sm:$0xff]  ;;  %v174_v3 = vld [vmem:[%s1311_s12 + $0xd8] sm:$0xff]  ;;  %v175_v5 = vld [vmem:[%s1311_s12 + $0xe0] sm:$0xff] }
  0x22   : > { %1102 = vmatprep.subr.mxu0 %v212_v11  ;;  %1213 = vmatprep.subr.mxu1 %v212_v11  ;;  %v206_v4 = vld [vmem:[%s1311_s12 + $0x1d8] sm:$0xff]  ;;  %v207_v6 = vld [vmem:[%s1311_s12 + $0x1e0] sm:$0xff]  ;;  %v176_v7 = vld [vmem:[%s1311_s12 + $0xe8] sm:$0xff] }
  0x23   : > { %1103 = vmatpush3.msra.mxu0 %v212_v11  ;;  %1226 = vmatpush3.msra.mxu1 %v212_v11  ;;  %v208_v8 = vld [vmem:[%s1311_s12 + $0x1e8] sm:$0xff]  ;;  %v177_v9 = vld [vmem:[%s1311_s12 + $0xf0] sm:$0xff]  ;;  %v178_v11 = vld [vmem:[%s1311_s12 + $0xf8] sm:$0xff] }
  0x24   : > { %1104 = vmatprep.subr.mxu0 %v211_v12  ;;  %1214 = vmatprep.subr.mxu1 %v211_v12  ;;  %v209_v10 = vld [vmem:[%s1311_s12 + $0x1f0] sm:$0xff] }
  0x25   : > { %1105 = vmatpush3.msra.mxu0 %v211_v12  ;;  %1227 = vmatpush3.msra.mxu1 %v211_v12  ;;  %v210_v12 = vld [vmem:[%s1311_s12 + $0x1f8] sm:$0xff] }
  0x26   : > { %1106 = vmatprep.mubr.msk.f32.mxu0 %vm224_vm1, %v147_v13  ;;  %1154 = vmatprep.mubr.msk.f32.mxu1 %vm224_vm1, %v179_v14 }
  0x27   : > { %1107 = vmatmul.mubr.msk.f32.vlgmr.msra.gmra.mxu0 %vm224_vm1, %v148_v15  ;;  %1155 = vmatmul.mubr.msk.f32.vlgmr.msra.gmra.mxu1 %vm224_vm1, %v180_v16 }
  0x28   : > { %1109 = vmatprep.mubr.msk.f32.mxu0 %vm224_vm1, %v149_v17  ;;  %1157 = vmatprep.mubr.msk.f32.mxu1 %vm224_vm1, %v181_v18 }
  0x2b   : > { %1110 = vmatmul.mubr.msk.f32.gmra.mxu0 %vm224_vm1, %v150_v19  ;;  %1158 = vmatmul.mubr.msk.f32.gmra.mxu1 %vm224_vm1, %v182_v20 }
  0x2c   : > { %1112 = vmatprep.mubr.msk.f32.mxu0 %vm224_vm1, %v151_v21  ;;  %1160 = vmatprep.mubr.msk.f32.mxu1 %vm224_vm1, %v183_v22 }
  0x2f   : > { %1113 = vmatmul.mubr.msk.f32.gmra.mxu0 %vm224_vm1, %v152_v23  ;;  %1161 = vmatmul.mubr.msk.f32.gmra.mxu1 %vm224_vm1, %v184_v24 }
  0x30   : > { %1115 = vmatprep.mubr.msk.f32.mxu0 %vm224_vm1, %v153_v25  ;;  %1163 = vmatprep.mubr.msk.f32.mxu1 %vm224_vm1, %v185_v26 }
  0x33   : > { %1116 = vmatmul.mubr.msk.f32.gmra.mxu0 %vm224_vm1, %v154_v27  ;;  %1164 = vmatmul.mubr.msk.f32.gmra.mxu1 %vm224_vm1, %v186_v28 }
  0x34   : > { %1118 = vmatprep.mubr.msk.f32.mxu0 %vm224_vm1, %v155_v29  ;;  %1166 = vmatprep.mubr.msk.f32.mxu1 %vm224_vm1, %v187_v30 }
  0x37   : > { %1119 = vmatmul.mubr.msk.f32.gmra.mxu0 %vm224_vm1, %v156_v31  ;;  %1167 = vmatmul.mubr.msk.f32.gmra.mxu1 %vm224_vm1, %v188_v32 }
  0x38   : > { %1121 = vmatprep.mubr.msk.f32.mxu0 %vm224_vm1, %v157_v33  ;;  %1169 = vmatprep.mubr.msk.f32.mxu1 %vm224_vm1, %v189_v34 }
  0x3b   : > { %1122 = vmatmul.mubr.msk.f32.gmra.mxu0 %vm224_vm1, %v158_v35  ;;  %1170 = vmatmul.mubr.msk.f32.gmra.mxu1 %vm224_vm1, %v190_v36 }
  0x3c   : > { %1124 = vmatprep.mubr.msk.f32.mxu0 %vm224_vm1, %v159_v37  ;;  %1172 = vmatprep.mubr.msk.f32.mxu1 %vm224_vm1, %v191_v38 }
  0x3f   : > { %1125 = vmatmul.mubr.msk.f32.gmra.mxu0 %vm224_vm1, %v160_v39  ;;  %1173 = vmatmul.mubr.msk.f32.gmra.mxu1 %vm224_vm1, %v192_v40 }
  0x40   : > { %1127 = vmatprep.mubr.msk.f32.mxu0 %vm224_vm1, %v161_v41  ;;  %1175 = vmatprep.mubr.msk.f32.mxu1 %vm224_vm1, %v193_v42 }
  0x43   : > { %1128 = vmatmul.mubr.msk.f32.gmra.mxu0 %vm224_vm1, %v162_v43  ;;  %1176 = vmatmul.mubr.msk.f32.gmra.mxu1 %vm224_vm1, %v194_v44 }
  0x44   : > { %1130 = vmatprep.mubr.msk.f32.mxu0 %vm224_vm1, %v163_v45  ;;  %1178 = vmatprep.mubr.msk.f32.mxu1 %vm224_vm1, %v195_v46 }
  0x47   : > { %1131 = vmatmul.mubr.msk.f32.gmra.mxu0 %vm224_vm1, %v164_v47  ;;  %1179 = vmatmul.mubr.msk.f32.gmra.mxu1 %vm224_vm1, %v196_v48 }
  0x48   : > { %1133 = vmatprep.mubr.msk.f32.mxu0 %vm224_vm1, %v165_v49  ;;  %1181 = vmatprep.mubr.msk.f32.mxu1 %vm224_vm1, %v197_v50 }
  0x4b   : > { %1134 = vmatmul.mubr.msk.f32.gmra.mxu0 %vm224_vm1, %v166_v51  ;;  %1182 = vmatmul.mubr.msk.f32.gmra.mxu1 %vm224_vm1, %v198_v52 }
  0x4c   : > { %1136 = vmatprep.mubr.msk.f32.mxu0 %vm224_vm1, %v167_v53  ;;  %1184 = vmatprep.mubr.msk.f32.mxu1 %vm224_vm1, %v199_v54 }
  0x4f   : > { %1137 = vmatmul.mubr.msk.f32.gmra.mxu0 %vm224_vm1, %v168_v55  ;;  %1185 = vmatmul.mubr.msk.f32.gmra.mxu1 %vm224_vm1, %v200_v56 }
  0x50   : > { %1139 = vmatprep.mubr.msk.f32.mxu0 %vm224_vm1, %v169_v57  ;;  %1187 = vmatprep.mubr.msk.f32.mxu1 %vm224_vm1, %v201_v58 }
  0x53   : > { %1140 = vmatmul.mubr.msk.f32.gmra.mxu0 %vm224_vm1, %v170_v59  ;;  %1188 = vmatmul.mubr.msk.f32.gmra.mxu1 %vm224_vm1, %v202_v60 }
  0x54   : > { %1142 = vmatprep.mubr.msk.f32.mxu0 %vm224_vm1, %v171_v61  ;;  %1190 = vmatprep.mubr.msk.f32.mxu1 %vm224_vm1, %v203_v62 }
  0x57   : > { %1143 = vmatmul.mubr.msk.f32.gmra.mxu0 %vm224_vm1, %v172_v63  ;;  %1191 = vmatmul.mubr.msk.f32.gmra.mxu1 %vm224_vm1, %v204_v0 }
  0x58   : > { %1145 = vmatprep.mubr.msk.f32.mxu0 %vm224_vm1, %v173_v1  ;;  %1193 = vmatprep.mubr.msk.f32.mxu1 %vm224_vm1, %v205_v2 }
  0x5b   : > { %1146 = vmatmul.mubr.msk.f32.gmra.mxu0 %vm224_vm1, %v174_v3  ;;  %1194 = vmatmul.mubr.msk.f32.gmra.mxu1 %vm224_vm1, %v206_v4 }
  0x5c   : > { %1148 = vmatprep.mubr.msk.f32.mxu0 %vm224_vm1, %v175_v5  ;;  %1196 = vmatprep.mubr.msk.f32.mxu1 %vm224_vm1, %v207_v6 }
  0x5f   : > { %1149 = vmatmul.mubr.msk.f32.gmra.mxu0 %vm224_vm1, %v176_v7  ;;  %1197 = vmatmul.mubr.msk.f32.gmra.mxu1 %vm224_vm1, %v208_v8 }
  0x60   : > { %1151 = vmatprep.mubr.msk.f32.mxu0 %vm224_vm1, %v177_v9  ;;  %1199 = vmatprep.mubr.msk.f32.mxu1 %vm224_vm1, %v209_v10 }
  0x63   : > { %1152 = vmatmul.mubr.msk.f32.gmra.mxu0 %vm224_vm1, %v178_v11  ;;  %1200 = vmatmul.mubr.msk.f32.gmra.mxu1 %vm224_vm1, %v210_v12 }
  0xe7   : > { %v1108_v13 = vpop.f32.mrf.mxu0  ;;  %v1156_v14 = vpop.f32.mrf.mxu1 }
  0xe8   : > { %808 = vst.msk [vmem:[%s1449_s17 + $0x8] sm:$0xff] %vm806_vm2, %v1108_v13  ;;  %840 = vst.msk [vmem:[%s1449_s17 + $0x108] sm:$0xff] %vm806_vm2, %v1156_v14 }
  0xe9   : > { %v487_v15 = vpop.f32.mrf.mxu0  ;;  %v647_v16 = vpop.f32.mrf.mxu1 }
  0xea   : > { %807 = vst.msk [vmem:[%s1449_s17] sm:$0xff] %vm806_vm2, %v487_v15  ;;  %839 = vst.msk [vmem:[%s1449_s17 + $0x100] sm:$0xff] %vm806_vm2, %v647_v16 }
  0xeb   : > { %v1111_v17 = vpop.f32.mrf.mxu0  ;;  %v1159_v18 = vpop.f32.mrf.mxu1 }
  0xec   : > { %810 = vst.msk [vmem:[%s1449_s17 + $0x18] sm:$0xff] %vm806_vm2, %v1111_v17  ;;  %842 = vst.msk [vmem:[%s1449_s17 + $0x118] sm:$0xff] %vm806_vm2, %v1159_v18 }
  0xed   : > { %v497_v19 = vpop.f32.mrf.mxu0  ;;  %v657_v20 = vpop.f32.mrf.mxu1 }
  0xee   : > { %809 = vst.msk [vmem:[%s1449_s17 + $0x10] sm:$0xff] %vm806_vm2, %v497_v19  ;;  %841 = vst.msk [vmem:[%s1449_s17 + $0x110] sm:$0xff] %vm806_vm2, %v657_v20 }
  0xef   : > { %v1114_v21 = vpop.f32.mrf.mxu0  ;;  %v1162_v22 = vpop.f32.mrf.mxu1 }
  0xf0   : > { %812 = vst.msk [vmem:[%s1449_s17 + $0x28] sm:$0xff] %vm806_vm2, %v1114_v21  ;;  %844 = vst.msk [vmem:[%s1449_s17 + $0x128] sm:$0xff] %vm806_vm2, %v1162_v22 }
  0xf1   : > { %v507_v23 = vpop.f32.mrf.mxu0  ;;  %v667_v24 = vpop.f32.mrf.mxu1 }
  0xf2   : > { %811 = vst.msk [vmem:[%s1449_s17 + $0x20] sm:$0xff] %vm806_vm2, %v507_v23  ;;  %843 = vst.msk [vmem:[%s1449_s17 + $0x120] sm:$0xff] %vm806_vm2, %v667_v24 }
  0xf3   : > { %v1117_v25 = vpop.f32.mrf.mxu0  ;;  %v1165_v26 = vpop.f32.mrf.mxu1 }
  0xf4   : > { %814 = vst.msk [vmem:[%s1449_s17 + $0x38] sm:$0xff] %vm806_vm2, %v1117_v25  ;;  %846 = vst.msk [vmem:[%s1449_s17 + $0x138] sm:$0xff] %vm806_vm2, %v1165_v26 }
  0xf5   : > { %v517_v27 = vpop.f32.mrf.mxu0  ;;  %v677_v28 = vpop.f32.mrf.mxu1 }
  0xf6   : > { %813 = vst.msk [vmem:[%s1449_s17 + $0x30] sm:$0xff] %vm806_vm2, %v517_v27  ;;  %845 = vst.msk [vmem:[%s1449_s17 + $0x130] sm:$0xff] %vm806_vm2, %v677_v28 }
  0xf7   : > { %v1120_v29 = vpop.f32.mrf.mxu0  ;;  %v1168_v30 = vpop.f32.mrf.mxu1 }
  0xf8   : > { %816 = vst.msk [vmem:[%s1449_s17 + $0x48] sm:$0xff] %vm806_vm2, %v1120_v29  ;;  %848 = vst.msk [vmem:[%s1449_s17 + $0x148] sm:$0xff] %vm806_vm2, %v1168_v30 }
  0xf9   : > { %v527_v31 = vpop.f32.mrf.mxu0  ;;  %v687_v32 = vpop.f32.mrf.mxu1 }
  0xfa   : > { %815 = vst.msk [vmem:[%s1449_s17 + $0x40] sm:$0xff] %vm806_vm2, %v527_v31  ;;  %847 = vst.msk [vmem:[%s1449_s17 + $0x140] sm:$0xff] %vm806_vm2, %v687_v32 }
  0xfb   : > { %v1123_v33 = vpop.f32.mrf.mxu0  ;;  %v1171_v34 = vpop.f32.mrf.mxu1 }
  0xfc   : > { %818 = vst.msk [vmem:[%s1449_s17 + $0x58] sm:$0xff] %vm806_vm2, %v1123_v33  ;;  %850 = vst.msk [vmem:[%s1449_s17 + $0x158] sm:$0xff] %vm806_vm2, %v1171_v34 }
  0xfd   : > { %v537_v35 = vpop.f32.mrf.mxu0  ;;  %v697_v36 = vpop.f32.mrf.mxu1 }
  0xfe   : > { %817 = vst.msk [vmem:[%s1449_s17 + $0x50] sm:$0xff] %vm806_vm2, %v537_v35  ;;  %849 = vst.msk [vmem:[%s1449_s17 + $0x150] sm:$0xff] %vm806_vm2, %v697_v36 }
  0xff   : > { %v1126_v37 = vpop.f32.mrf.mxu0  ;;  %v1174_v38 = vpop.f32.mrf.mxu1 }
 0x100   : > { %820 = vst.msk [vmem:[%s1449_s17 + $0x68] sm:$0xff] %vm806_vm2, %v1126_v37  ;;  %852 = vst.msk [vmem:[%s1449_s17 + $0x168] sm:$0xff] %vm806_vm2, %v1174_v38 }
 0x101   : > { %v547_v39 = vpop.f32.mrf.mxu0  ;;  %v707_v40 = vpop.f32.mrf.mxu1 }
 0x102   : > { %819 = vst.msk [vmem:[%s1449_s17 + $0x60] sm:$0xff] %vm806_vm2, %v547_v39  ;;  %851 = vst.msk [vmem:[%s1449_s17 + $0x160] sm:$0xff] %vm806_vm2, %v707_v40 }
 0x103   : > { %v1129_v41 = vpop.f32.mrf.mxu0  ;;  %v1177_v42 = vpop.f32.mrf.mxu1 }
 0x104   : > { %822 = vst.msk [vmem:[%s1449_s17 + $0x78] sm:$0xff] %vm806_vm2, %v1129_v41  ;;  %854 = vst.msk [vmem:[%s1449_s17 + $0x178] sm:$0xff] %vm806_vm2, %v1177_v42 }
 0x105   : > { %v557_v43 = vpop.f32.mrf.mxu0  ;;  %v717_v44 = vpop.f32.mrf.mxu1 }
 0x106   : > { %821 = vst.msk [vmem:[%s1449_s17 + $0x70] sm:$0xff] %vm806_vm2, %v557_v43  ;;  %853 = vst.msk [vmem:[%s1449_s17 + $0x170] sm:$0xff] %vm806_vm2, %v717_v44 }
 0x107   : > { %v1132_v45 = vpop.f32.mrf.mxu0  ;;  %v1180_v46 = vpop.f32.mrf.mxu1 }
 0x108   : > { %824 = vst.msk [vmem:[%s1449_s17 + $0x88] sm:$0xff] %vm806_vm2, %v1132_v45  ;;  %856 = vst.msk [vmem:[%s1449_s17 + $0x188] sm:$0xff] %vm806_vm2, %v1180_v46 }
 0x109   : > { %v567_v47 = vpop.f32.mrf.mxu0  ;;  %v727_v48 = vpop.f32.mrf.mxu1 }
 0x10a   : > { %823 = vst.msk [vmem:[%s1449_s17 + $0x80] sm:$0xff] %vm806_vm2, %v567_v47  ;;  %855 = vst.msk [vmem:[%s1449_s17 + $0x180] sm:$0xff] %vm806_vm2, %v727_v48 }
 0x10b   : > { %v1135_v49 = vpop.f32.mrf.mxu0  ;;  %v1183_v50 = vpop.f32.mrf.mxu1 }
 0x10c   : > { %826 = vst.msk [vmem:[%s1449_s17 + $0x98] sm:$0xff] %vm806_vm2, %v1135_v49  ;;  %858 = vst.msk [vmem:[%s1449_s17 + $0x198] sm:$0xff] %vm806_vm2, %v1183_v50 }
 0x10d   : > { %v577_v51 = vpop.f32.mrf.mxu0  ;;  %v737_v52 = vpop.f32.mrf.mxu1 }
 0x10e   : > { %825 = vst.msk [vmem:[%s1449_s17 + $0x90] sm:$0xff] %vm806_vm2, %v577_v51  ;;  %857 = vst.msk [vmem:[%s1449_s17 + $0x190] sm:$0xff] %vm806_vm2, %v737_v52 }
 0x10f   : > { %v1138_v53 = vpop.f32.mrf.mxu0  ;;  %v1186_v54 = vpop.f32.mrf.mxu1 }
 0x110   : > { %828 = vst.msk [vmem:[%s1449_s17 + $0xa8] sm:$0xff] %vm806_vm2, %v1138_v53  ;;  %860 = vst.msk [vmem:[%s1449_s17 + $0x1a8] sm:$0xff] %vm806_vm2, %v1186_v54 }
 0x111   : > { %v587_v55 = vpop.f32.mrf.mxu0  ;;  %v747_v56 = vpop.f32.mrf.mxu1 }
 0x112   : > { %827 = vst.msk [vmem:[%s1449_s17 + $0xa0] sm:$0xff] %vm806_vm2, %v587_v55  ;;  %859 = vst.msk [vmem:[%s1449_s17 + $0x1a0] sm:$0xff] %vm806_vm2, %v747_v56 }
 0x113   : > { %v1141_v57 = vpop.f32.mrf.mxu0  ;;  %v1189_v58 = vpop.f32.mrf.mxu1 }
 0x114   : > { %830 = vst.msk [vmem:[%s1449_s17 + $0xb8] sm:$0xff] %vm806_vm2, %v1141_v57  ;;  %862 = vst.msk [vmem:[%s1449_s17 + $0x1b8] sm:$0xff] %vm806_vm2, %v1189_v58 }
 0x115   : > { %v597_v59 = vpop.f32.mrf.mxu0  ;;  %v757_v60 = vpop.f32.mrf.mxu1 }
 0x116   : > { %829 = vst.msk [vmem:[%s1449_s17 + $0xb0] sm:$0xff] %vm806_vm2, %v597_v59  ;;  %861 = vst.msk [vmem:[%s1449_s17 + $0x1b0] sm:$0xff] %vm806_vm2, %v757_v60 }
 0x117   : > { %v1144_v61 = vpop.f32.mrf.mxu0  ;;  %v1192_v62 = vpop.f32.mrf.mxu1 }
 0x118   : > { %832 = vst.msk [vmem:[%s1449_s17 + $0xc8] sm:$0xff] %vm806_vm2, %v1144_v61  ;;  %864 = vst.msk [vmem:[%s1449_s17 + $0x1c8] sm:$0xff] %vm806_vm2, %v1192_v62 }
 0x119   : > { %v607_v63 = vpop.f32.mrf.mxu0  ;;  %v767_v0 = vpop.f32.mrf.mxu1 }
 0x11a   : > { %831 = vst.msk [vmem:[%s1449_s17 + $0xc0] sm:$0xff] %vm806_vm2, %v607_v63  ;;  %863 = vst.msk [vmem:[%s1449_s17 + $0x1c0] sm:$0xff] %vm806_vm2, %v767_v0 }
 0x11b   : > { %v1147_v1 = vpop.f32.mrf.mxu0  ;;  %v1195_v2 = vpop.f32.mrf.mxu1 }
 0x11c   : > { %834 = vst.msk [vmem:[%s1449_s17 + $0xd8] sm:$0xff] %vm806_vm2, %v1147_v1  ;;  %866 = vst.msk [vmem:[%s1449_s17 + $0x1d8] sm:$0xff] %vm806_vm2, %v1195_v2 }
 0x11d   : > { %v617_v3 = vpop.f32.mrf.mxu0  ;;  %v777_v4 = vpop.f32.mrf.mxu1 }
 0x11e   : > { %833 = vst.msk [vmem:[%s1449_s17 + $0xd0] sm:$0xff] %vm806_vm2, %v617_v3  ;;  %865 = vst.msk [vmem:[%s1449_s17 + $0x1d0] sm:$0xff] %vm806_vm2, %v777_v4 }
 0x11f   : > { %v1150_v5 = vpop.f32.mrf.mxu0  ;;  %v1198_v6 = vpop.f32.mrf.mxu1 }
 0x120   : > { %836 = vst.msk [vmem:[%s1449_s17 + $0xe8] sm:$0xff] %vm806_vm2, %v1150_v5  ;;  %868 = vst.msk [vmem:[%s1449_s17 + $0x1e8] sm:$0xff] %vm806_vm2, %v1198_v6 }
 0x121   : > { %v627_v7 = vpop.f32.mrf.mxu0  ;;  %v787_v8 = vpop.f32.mrf.mxu1 }
 0x122   : > { %835 = vst.msk [vmem:[%s1449_s17 + $0xe0] sm:$0xff] %vm806_vm2, %v627_v7  ;;  %867 = vst.msk [vmem:[%s1449_s17 + $0x1e0] sm:$0xff] %vm806_vm2, %v787_v8 }
 0x123   : > { %v1153_v9 = vpop.f32.mrf.mxu0  ;;  %v1201_v10 = vpop.f32.mrf.mxu1 }
 0x124   : > { %838 = vst.msk [vmem:[%s1449_s17 + $0xf8] sm:$0xff] %vm806_vm2, %v1153_v9  ;;  %870 = vst.msk [vmem:[%s1449_s17 + $0x1f8] sm:$0xff] %vm806_vm2, %v1201_v10 }
 0x125   : > { %v637_v11 = vpop.f32.mrf.mxu0  ;;  %v797_v12 = vpop.f32.mrf.mxu1 }
 0x126   : > { %837 = vst.msk [vmem:[%s1449_s17 + $0xf0] sm:$0xff] %vm806_vm2, %v637_v11  ;;  %869 = vst.msk [vmem:[%s1449_s17 + $0x1f0] sm:$0xff] %vm806_vm2, %v797_v12 }
 0x127 PF: > { %s12_s9 = sadd.s32 1, %s1242_s9  }
 0x128   : > { %p9_p4 = scmp.ge.s32.totalorder %s12_s9, 4  }
 0x12a   :  { %11 = sbr.rel (!%p9_p4) target bundleno = 1 (0x1), region = 58 }

</bundles_post_ra>
